<compile_context>
chip_gen: v5e
topology: v5e:2x2
jax: 0.10.0
libtpu: 0.0.40
codegen_flags: <defaults>
</compile_context>

<pallas_src>
import functools
import math

import jax
import jax.numpy as jnp
from jax.experimental import pallas as pl
from jax.experimental.pallas import tpu as pltpu


def _leaky_relu_kernel(x_ref, ld_in_ref, y_ref, ld_ref, *, slope, log_slope):
    """x_ref / y_ref: (TB, TN) tile of the flattened input / output.
    ld_in_ref: (TB, 1) incoming per-batch logdet (f32).
    ld_ref   : (TB, 1) per-batch logdet accumulator; its block index only
    depends on the batch grid axis, so it stays resident and accumulates
    across the tile axis (seeded with the incoming logdet at j == 0)."""
    j = pl.program_id(1)

    @pl.when(j == 0)
    def _init():
        # Seed with the incoming logdet -> fuses `logdet + dlogdet` in-kernel.
        ld_ref[...] = ld_in_ref[...]

    x = x_ref[...]                                         # (TB, TN), x.dtype
    pos = x > jnp.zeros((), dtype=x.dtype)
    y_ref[...] = jnp.where(pos, x, x * jnp.asarray(slope, dtype=x.dtype))

    # Jacobian is diagonal: log|dy/dx| = 0 where x > 0, log(slope) otherwise.
    ld_ref[...] += jnp.sum(
        jnp.where(pos, jnp.float32(0.0), jnp.float32(log_slope)),
        axis=1, keepdims=True)                             # (TB, 1) f32


def _choose_block(B, N, itemsize, target_bytes):
    """Pick a (TB, TN) block: TN is a large multiple of 128 dividing N (or the
    full N), TB is a multiple of 8 dividing B (or the full B), with the block
    capped around `target_bytes` so x+y double-buffering fits scoped VMEM on
    every TPU generation."""
    tb0 = B if (B % 8 != 0) else min(B, 8)

    if N % 128 == 0:
        budget_n = max(128, target_bytes // (tb0 * itemsize))
        tn, c = 128, 128
        limit = min(N, budget_n)
        while c <= limit:
            if N % c == 0:
                tn = c
            c += 128
    else:
        tn = N                      # full last dim (always a legal block)

    # Grow the batch tile within budget (keeping 8-multiple / full-B legality).
    tb, c = tb0, tb0
    while c <= B and c * tn * itemsize <= target_bytes:
        if B % c == 0:
            tb = c
        c += tb0
    return tb, tn


def invertible_leaky_relu_forward(x, logdet, negative_slope=0.1,
                                  target_block_bytes=4 * 1024 * 1024):
    """Forward pass of InvertibleLeakyReLU.

    x       : (B, ...) tensor (e.g. (B, C, H, W)), any float dtype
    logdet  : (B,) (or broadcastable) accumulated log-determinant
    returns : (leaky_relu(x, slope), logdet + per-batch dlogdet)
    """
    assert 0.0 < negative_slope < 1.0
    orig_shape = x.shape
    B = orig_shape[0]
    N = 1
    for d in orig_shape[1:]:
        N *= d

    x_flat = x.reshape(B, N)                     # free for contiguous input
    logdet_2d = jnp.broadcast_to(
        jnp.asarray(logdet, dtype=jnp.float32).reshape(-1), (B,)).reshape(B, 1)

    itemsize = x_flat.dtype.itemsize
    TB, TN = _choose_block(B, N, itemsize, target_block_bytes)

    kernel = functools.partial(
        _leaky_relu_kernel,
        slope=float(negative_slope),
        log_slope=math.log(negative_slope))

    y_flat, ld = pl.pallas_call(
        kernel,
        out_shape=(
            jax.ShapeDtypeStruct((B, N), x_flat.dtype),    # y (keeps x dtype)
            jax.ShapeDtypeStruct((B, 1), jnp.float32),     # logdet + dlogdet
        ),
        grid_spec=pltpu.PrefetchScalarGridSpec(
            num_scalar_prefetch=0,
            grid=(B // TB, N // TN),
            in_specs=[
                pl.BlockSpec((TB, TN), lambda i, j: (i, j)),   # x tile
                pl.BlockSpec((TB, 1), lambda i, j: (i, 0)),    # incoming logdet
            ],
            out_specs=[
                pl.BlockSpec((TB, TN), lambda i, j: (i, j)),   # y tile
                pl.BlockSpec((TB, 1), lambda i, j: (i, 0)),    # logdet acc
            ],
        ),
        compiler_params=pltpu.CompilerParams(
            dimension_semantics=("parallel", "arbitrary"),
            vmem_limit_bytes=32 * 1024 * 1024),
    )(x_flat, logdet_2d)

    # TODO(synk): the PyTorch logdet() also mutates x in-place via
    # masked_fill_; that side effect has no functional JAX equivalent and is
    # irrelevant to the returned values, so it is intentionally not reproduced.
    return y_flat.reshape(orig_shape), ld[:, 0]


if __name__ == "__main__":
    B, C, H, W = 2, 4, 16, 16
    slope = 0.1

    key = jax.random.PRNGKey(0)
    x = jax.random.normal(key, (B, C, H, W), dtype=jnp.float32)
    logdet_in = jnp.zeros((B,), dtype=jnp.float32)

    y, logdet_out = invertible_leaky_relu_forward(x, logdet_in,
                                                  negative_slope=slope)
    jax.block_until_ready((y, logdet_out))

    # Pure-JAX reference check.
    y_ref = jnp.where(x > 0, x, slope * x)
    dlogdet_ref = jnp.sum(
        jnp.where(x.reshape(B, -1) > 0, 0.0, jnp.log(jnp.float32(slope))),
        axis=1)

    assert jnp.allclose(y, y_ref, atol=1e-6, rtol=1e-6), "y mismatch"
    assert jnp.allclose(logdet_out, logdet_in + dlogdet_ref,
                        atol=1e-3, rtol=1e-5), "logdet mismatch"

    print("KERNEL_OK")
</pallas_src>

<mosaic_0001>
module attributes {stable_mosaic.version = 11 : i64} {
  func.func @_leaky_relu_kernel(%arg0: i32, %arg1: i32, %arg2: memref<2x1024xf32, #tpu.memory_space<vmem>>, %arg3: memref<2x1xf32, #tpu.memory_space<vmem>>, %arg4: memref<2x1024xf32, #tpu.memory_space<vmem>>, %arg5: memref<2x1xf32, #tpu.memory_space<vmem>>) attributes {dimension_semantics = [#tpu.dimension_semantics<parallel>, #tpu.dimension_semantics<arbitrary>], iteration_bounds = array<i64: 1, 1>, scalar_prefetch = 0 : i64, scratch_operands = 0 : i64, tpu.core_type = #tpu.core_type<tc>, window_params = [{transform_indices = @transform_0, window_bounds = array<i64: 2, 1024>}, {transform_indices = @transform_1, window_bounds = array<i64: 2, 1>}, {transform_indices = @transform_2, window_bounds = array<i64: 2, 1024>}, {transform_indices = @transform_3, window_bounds = array<i64: 2, 1>}]} {
    %c0_i32 = arith.constant 0 : i32
    %0 = arith.cmpi eq, %arg1, %c0_i32 : i32
    %1 = arith.extui %0 : i1 to i32
    %c0_i32_0 = arith.constant 0 : i32
    %2 = arith.cmpi ne, %1, %c0_i32_0 : i32
    scf.if %2 {
      %c0_12 = arith.constant 0 : index
      %c0_13 = arith.constant 0 : index
      %18 = vector.load %arg3[%c0_12, %c0_13] : memref<2x1xf32, #tpu.memory_space<vmem>>, vector<2x1xf32>
      %c0_14 = arith.constant 0 : index
      %c0_15 = arith.constant 0 : index
      %19 = vector.load %arg5[%c0_14, %c0_15] : memref<2x1xf32, #tpu.memory_space<vmem>>, vector<2x1xf32>
      tpu.vector_store %arg5[%c0_14, %c0_15], %18 {strides = array<i32>} : memref<2x1xf32, #tpu.memory_space<vmem>>, vector<2x1xf32>,
    } else {
    }
    %c0 = arith.constant 0 : index
    %c0_1 = arith.constant 0 : index
    %3 = vector.load %arg2[%c0, %c0_1] : memref<2x1024xf32, #tpu.memory_space<vmem>>, vector<2x1024xf32>
    %cst = arith.constant 0.000000e+00 : f32
    %4 = vector.broadcast %cst : f32 to vector<2x1024xf32>
    %5 = arith.cmpf ogt, %3, %4 : vector<2x1024xf32>
    %cst_2 = arith.constant 1.000000e-01 : f32
    %6 = vector.broadcast %cst_2 : f32 to vector<2x1024xf32>
    %7 = arith.mulf %3, %6 : vector<2x1024xf32>
    %8 = arith.select %5, %3, %7 : vector<2x1024xi1>, vector<2x1024xf32>
    %c0_3 = arith.constant 0 : index
    %c0_4 = arith.constant 0 : index
    %9 = vector.load %arg4[%c0_3, %c0_4] : memref<2x1024xf32, #tpu.memory_space<vmem>>, vector<2x1024xf32>
    tpu.vector_store %arg4[%c0_3, %c0_4], %8 {strides = array<i32>} : memref<2x1024xf32, #tpu.memory_space<vmem>>, vector<2x1024xf32>,
    %c0_5 = arith.constant 0 : index
    %c0_6 = arith.constant 0 : index
    %10 = vector.load %arg5[%c0_5, %c0_6] : memref<2x1xf32, #tpu.memory_space<vmem>>, vector<2x1xf32>
    %cst_7 = arith.constant 0.000000e+00 : f32
    %cst_8 = arith.constant -2.30258512 : f32
    %11 = vector.broadcast %cst_7 : f32 to vector<2x1024xf32>
    %12 = vector.broadcast %cst_8 : f32 to vector<2x1024xf32>
    %13 = arith.select %5, %11, %12 : vector<2x1024xi1>, vector<2x1024xf32>
    %cst_9 = arith.constant dense<0.000000e+00> : vector<2xf32>
    %14 = vector.multi_reduction <add>, %13, %cst_9 [1] : vector<2x1024xf32> to vector<2xf32>
    %15 = vector.shape_cast %14 : vector<2xf32> to vector<2x1xf32>
    %16 = arith.addf %10, %15 : vector<2x1xf32>
    %c0_10 = arith.constant 0 : index
    %c0_11 = arith.constant 0 : index
    %17 = vector.load %arg5[%c0_10, %c0_11] : memref<2x1xf32, #tpu.memory_space<vmem>>, vector<2x1xf32>
    tpu.vector_store %arg5[%c0_10, %c0_11], %16 {strides = array<i32>} : memref<2x1xf32, #tpu.memory_space<vmem>>, vector<2x1xf32>,
    return
  }
  func.func @transform_0(%arg0: i32, %arg1: i32) -> (i32, i32) {
    %c0_i32 = arith.constant 0 : i32
    return %arg0, %arg1 : i32, i32
  }
  func.func @transform_1(%arg0: i32, %arg1: i32) -> (i32, i32) {
    %c0_i32 = arith.constant 0 : i32
    %c0_i32_0 = arith.constant 0 : i32
    return %arg0, %c0_i32 : i32, i32
  }
  func.func @transform_2(%arg0: i32, %arg1: i32) -> (i32, i32) {
    %c0_i32 = arith.constant 0 : i32
    return %arg0, %arg1 : i32, i32
  }
  func.func @transform_3(%arg0: i32, %arg1: i32) -> (i32, i32) {
    %c0_i32 = arith.constant 0 : i32
    %c0_i32_0 = arith.constant 0 : i32
    return %arg0, %c0_i32 : i32, i32
  }
}

</mosaic_0001>

<bundles_post_ra>
// kernel: tpu_custom_call.1
= control target key start
LH: loop header
LB: loop body
LE: loop exit
PB: predicated region body
PF: predicated region fallthrough
CT: control target
= control target key end

     0   :  { %9 = vsyncpa [#allocation3], 0  ;;  %s221_s0 = inlined_call_operand.hbm [shape: f32[2,1024], index: 0, kind: input, shape index: {}]   ;;  %s222_s1 = inlined_call_operand.vmem [shape: f32[2,1], index: 1, kind: input, shape index: {}]   ;;  %s223_s2 = inlined_call_operand.hbm [shape: f32[2,1024], index: 2, kind: output, shape index: {0}]   ;;  %s224_s3 = inlined_call_operand.vmem [shape: f32[2,1], index: 3, kind: output, shape index: {1}]  }
   0x1   :  { %10 = vsyncpa [#allocation4], 0  ;;  %s16_s14 = sshll.u32 %s221_s0, 4  ;;  %s166_s15 = smov [#allocation2]   ;;  %s17_s14 = int_to_ptr.hbm [resolvable:$true] %s16_s14 }
   0x2   :  { %s18_s16 = sshll.u32 %s166_s15, 4  ;;  %s19_s16 = int_to_ptr.vmem [resolvable:$true] %s18_s16 }
   0x3   :  { %21 = dma.hbm_to_vmem [thread:$0]  %s17_s14, 256, %s19_s16, [#allocation3]  }
   0x4   :  { %162 = dma.done.wait [#allocation3], 256  }
   0x5   :  { %163 = vsyncadd [#allocation3], 4294967040  ;;  %vm33_vm0 = vcmask 1024   ;;  %v35_v0 = vld [vmem:[#allocation2] sm:$0xff]  ;;  %v36_v1 = vld [vmem:[#allocation2 + $0x8] sm:$0xff]  ;;  %vm69_vm3 = vcmask 1041408  }
   0x6   :  { %v32_v2 = vld [vmem:[%s222_s1] sm:$0x3]  ;;  %vm37_vm1 = vcmp.gt.f32.partialorder %v35_v0, 0.0  ;;  %vm38_vm2 = vcmp.gt.f32.partialorder %v36_v1, 0.0  ;;  %v167_v3 = vmov -2.3025851  }
   0x7   :  { %34 = vst.msk [vmem:[%s224_s3] sm:$0x3] %vm33_vm0, %v32_v2  ;;  %v46_v4 = vsel %vm37_vm1, 0.0, %v167_v3  ;;  %v47_v5 = vsel %vm38_vm2, 0.0, %v167_v3  ;;  %s168_s0 = smov [#allocation5]   ;;  %s97_s23 = sshll.u32 %s223_s2, 4  ;;  %s98_s23 = int_to_ptr.hbm [resolvable:$true] %s97_s23 }
   0x8   :  { %50 = vst [vmem:[#allocation1] ss:$4 sm:$0xff] %v46_v4  ;;  %s95_s1 = sshll.u32 %s168_s0, 4  ;;  %v39_v29 = vmul.f32 0.1, %v35_v0  ;;  %s96_s1 = int_to_ptr.vmem [resolvable:$true] %s95_s1 }
   0x9   :  { %52 = vst [vmem:[#allocation1 + $0x20] ss:$4 sm:$0xff] %v47_v5  ;;  %v40_v30 = vmul.f32 0.1, %v36_v1 }
   0xa   :  { %v41_v31 = vsel %vm37_vm1, %v35_v0, %v39_v29 }
   0xb   :  { %v42_v32 = vsel %vm38_vm2, %v36_v1, %v40_v30  ;;  %43 = vst [vmem:[#allocation5] sm:$0xff] %v41_v31 }
   0xc   :  { %44 = vst [vmem:[#allocation5 + $0x8] sm:$0xff] %v42_v32 }
   0xd   :  { %100 = dma.vmem_to_hbm [thread:$0]  %s96_s1, 256, %s98_s23, [#allocation4]  }
   0xe   :  { %v45_v33 = vld [vmem:[%s224_s3] sm:$0x3] }
   0xf   :  { %v53_v6 = vld.sshfl [vmem:[#allocation1] sm:$0xff pattern:$0x73625140]  ;;  %v54_v7 = vld.sshfl [vmem:[#allocation1 + $0x8] sm:$0xff pattern:$0x73625140] }
  0x10   :  { %v55_v8 = vld.sshfl [vmem:[#allocation1 + $0x10] sm:$0xff pattern:$0x73625140]  ;;  %v56_v9 = vld.sshfl [vmem:[#allocation1 + $0x18] sm:$0xff pattern:$0x73625140] }
  0x11   :  { %v70_v10 = vsel %vm69_vm3, %v53_v6, 0.0  ;;  %v71_v11 = vsel %vm69_vm3, %v54_v7, 0.0  ;;  %v73_v12 = vsel %vm69_vm3, %v55_v8, 0.0  ;;  %v57_v13 = vld.sshfl [vmem:[#allocation1 + $0x20] sm:$0xff pattern:$0x73625140] }
  0x12   :  { %v72_v14 = vadd.f32 %v71_v11, %v70_v10  ;;  %v75_v15 = vsel %vm69_vm3, %v56_v9, 0.0  ;;  %v58_v16 = vld.sshfl [vmem:[#allocation1 + $0x28] sm:$0xff pattern:$0x73625140]  ;;  %v77_v18 = vsel %vm69_vm3, %v57_v13, 0.0 }
  0x13   :  { %v59_v19 = vld.sshfl [vmem:[#allocation1 + $0x30] sm:$0xff pattern:$0x73625140]  ;;  %v79_v21 = vsel %vm69_vm3, %v58_v16, 0.0 }
  0x14   :  { %v74_v17 = vadd.f32 %v73_v12, %v72_v14  ;;  %v60_v22 = vld.sshfl [vmem:[#allocation1 + $0x38] sm:$0xff pattern:$0x73625140]  ;;  %v81_v24 = vsel %vm69_vm3, %v59_v19, 0.0 }
  0x15   :  { %v83_v26 = vsel %vm69_vm3, %v60_v22, 0.0 }
  0x16   :  { %v76_v20 = vadd.f32 %v75_v15, %v74_v17 }
  0x18   :  { %v78_v23 = vadd.f32 %v77_v18, %v76_v20 }
  0x1a   :  { %v80_v25 = vadd.f32 %v79_v21, %v78_v23 }
  0x1c   :  { %v82_v27 = vadd.f32 %v81_v24, %v80_v25 }
  0x1e   :  { %v84_v28 = vadd.f32 %v83_v26, %v82_v27 }
  0x20   :  { %85 = vadd.xlane.f32.xlu0 %v84_v28 }
  0x93   :  { %v86_v34 = vpop.xlane.xlu0 %85 }
  0x94   :  { %v87_v35 = vadd.f32 %v86_v34, %v45_v33 }
  0x96   :  { %89 = vst.msk [vmem:[%s224_s3] sm:$0x3] %vm33_vm0, %v87_v35 }
  0x97   :  { %164 = dma.done.wait [#allocation4], 256  }
  0x98   :  { %165 = vsyncadd [#allocation4], 4294967040 }
  0x99   :  { %109 = vsyncpa [#allocation3], 1 }
  0x9a   :  { %110 = vsyncpa [#allocation4], 1 }

</bundles_post_ra>
